<compile_context>
chip_gen: v5e
topology: v5e:2x2
jax: 0.10.0
libtpu: 0.0.40
codegen_flags: <defaults>
</compile_context>

<pallas_src>
import functools

import jax
import jax.numpy as jnp
from jax.experimental import pallas as pl
from jax.experimental.pallas import tpu as pltpu


def _r_func_kernel(sig_ref, m_ref, l_ref, w1_ref, b1_ref, w2_ref, b2_ref,
                   out_ref, *, H):
    # sig_ref : (B,) f32, SMEM          per-batch scalar gate
    # m_ref   : (1, C_in, W) f32        pooled + interpolated high-res features
    # l_ref   : (1, TC, H*W) native     low-res feature tile (lane-dense)
    # w1_ref  : (C_mid, C_in) f32       1x1 conv with eval-mode BN folded in
    # b1_ref  : (C_mid, 1) f32
    # w2_ref  : (TC, C_mid) f32         1x1 conv tile (rows of conv_h)
    # b2_ref  : (TC, 1) f32
    m = m_ref[0]                                                    # (C_in, W)

    # dcov (1x1 conv, BN folded) + ReLU6
    t = jnp.dot(w1_ref[...], m, preferred_element_type=jnp.float32) + b1_ref[...]
    t = jnp.clip(t, 0.0, 6.0)

    # conv_h tile (1x1 conv) + sigmoid gate
    a = jnp.dot(w2_ref[...], t, preferred_element_type=jnp.float32) + b2_ref[...]
    gate = jax.nn.sigmoid(a)                                        # (TC, W) f32

    s = sig_ref[pl.program_id(0)]                                   # scalar (SMEM)
    # out = l + s*(l*gate) == l * (1 + s*gate); broadcast across H by lane tiling
    # (flat index h*W + w -> gate[:, w], matching the NCHW -> (C, H*W) reshape).
    scale = jnp.tile(1.0 + s * gate, (1, H))                        # (TC, H*W) f32
    out_ref[0] = (l_ref[0].astype(jnp.float32) * scale).astype(out_ref.dtype)


def init_params(key, int_c, out_c, reduction=32):
    mid = out_c // reduction
    k1, k2, k3, k4, k5, k6 = jax.random.split(key, 6)
    w1 = 0.1 * jax.random.normal(k1, (mid, int_c), jnp.float32)     # Conv2d 1x1
    b1 = 0.1 * jax.random.normal(k2, (mid, 1), jnp.float32)
    gamma = 1.0 + 0.1 * jax.random.normal(k3, (mid, 1), jnp.float32)
    beta = 0.1 * jax.random.normal(k4, (mid, 1), jnp.float32)
    running_mean = jnp.zeros((mid, 1), jnp.float32)
    running_var = jnp.ones((mid, 1), jnp.float32)
    eps = 1e-5
    # TODO(synk): BatchNorm applied in eval mode (running stats), not training-mode batch stats.
    bn_scale = gamma / jnp.sqrt(running_var + eps)
    bn_shift = beta - running_mean * bn_scale
    w2 = 0.1 * jax.random.normal(k5, (out_c, mid), jnp.float32)     # Conv2d 1x1
    b2 = 0.1 * jax.random.normal(k6, (out_c, 1), jnp.float32)
    return (w1, b1, bn_scale, bn_shift, w2, b2)


def _pool_and_interp(h_x, W_out):
    """AdaptiveAvgPool2d((1, None)) then F.interpolate(size=(1, W_out), bilinear,
    align_corners=False). H collapses to 1, so bilinear == 1-D linear in W."""
    m = jnp.mean(h_x, axis=2)                                       # (B, C_in, W_in)
    W_in = m.shape[-1]
    scale = W_in / W_out
    src = (jnp.arange(W_out, dtype=jnp.float32) + 0.5) * scale - 0.5
    src = jnp.maximum(src, 0.0)                                     # PyTorch clamp
    x0 = jnp.floor(src).astype(jnp.int32)
    x1 = jnp.minimum(x0 + 1, W_in - 1)
    lam = src - x0.astype(jnp.float32)
    return jnp.take(m, x0, axis=-1) * (1.0 - lam) + jnp.take(m, x1, axis=-1) * lam


def _pick_cout_tile(c_out, hw, itemsize, target_bytes=2 << 20):
    """Largest divisor of c_out keeping an l/out tile <= ~2 MiB, sublane-aligned."""
    cands = [d for d in range(1, c_out + 1)
             if c_out % d == 0 and (d == c_out or d % 8 == 0)]
    fitting = [d for d in cands if d * hw * itemsize <= target_bytes]
    return max(fitting) if fitting else min(cands)


def r_func_forward(h_x, l_x, sig, params):
    B, C_out, H, W = l_x.shape
    C_in = h_x.shape[1]
    w1, b1, bn_scale, bn_shift, w2, b2 = params
    C_mid = w1.shape[0]

    # Tiny host-side prep: fold eval-mode BN into the first 1x1 conv.
    w1f = (w1 * bn_scale).astype(jnp.float32)                       # (C_mid, C_in)
    b1f = (b1 * bn_scale + bn_shift).astype(jnp.float32)            # (C_mid, 1)
    m_i = _pool_and_interp(h_x, W).astype(jnp.float32)              # (B, C_in, W)
    sig1 = sig.reshape(B).astype(jnp.float32)

    # Lane-dense layout: flatten (H, W) so stores use full 128-lane vregs.
    HW = H * W
    l3 = l_x.reshape(B, C_out, HW)                                  # no dtype change
    itemsize = jnp.dtype(l_x.dtype).itemsize
    TC = _pick_cout_tile(C_out, HW, itemsize)

    # VMEM budget: double-buffered l/out tiles + m tile + tiled weights + slack.
    vmem_est = 2 * TC * HW * itemsize * 2
    vmem_est += 2 * C_in * W * 4
    vmem_est += 2 * 4 * (C_mid * C_in + C_mid + TC * C_mid + TC)
    vmem_est += 4 << 20
    vmem_limit = int(min(max(vmem_est, 32 << 20), 64 << 20))

    kernel = functools.partial(_r_func_kernel, H=H)

    # NOTE: could pass input_output_aliases={2: 0} to reuse l_x's buffer when the
    # caller does not need l_x afterwards; not done here (test reuses l_x).
    out3 = pl.pallas_call(
        kernel,
        out_shape=jax.ShapeDtypeStruct((B, C_out, HW), l_x.dtype),
        grid=(B, C_out // TC),
        in_specs=[
            pl.BlockSpec(memory_space=pltpu.MemorySpace.SMEM),       # sig (scalars)
            pl.BlockSpec((1, C_in, W), lambda b, c: (b, 0, 0)),      # m_i
            pl.BlockSpec((1, TC, HW), lambda b, c: (b, c, 0)),       # l tile
            pl.BlockSpec((C_mid, C_in), lambda b, c: (0, 0)),        # w1 (BN folded)
            pl.BlockSpec((C_mid, 1), lambda b, c: (0, 0)),           # b1 (BN folded)
            pl.BlockSpec((TC, C_mid), lambda b, c: (c, 0)),          # w2 tile
            pl.BlockSpec((TC, 1), lambda b, c: (c, 0)),              # b2 tile
        ],
        out_specs=pl.BlockSpec((1, TC, HW), lambda b, c: (b, c, 0)),
        compiler_params=pltpu.CompilerParams(
            dimension_semantics=("parallel", "parallel"),
            vmem_limit_bytes=vmem_limit),
    )(sig1, m_i, l3, w1f, b1f, w2, b2)
    return out3.reshape(B, C_out, H, W)


def _reference(h_x, l_x, sig, params):
    """Pure-JAX replica of r_func.forward (eval-mode BN) for validation."""
    w1, b1, bn_scale, bn_shift, w2, b2 = params
    B, C_out, H, W = l_x.shape
    m_i = _pool_and_interp(h_x, W)                                  # (B, C_in, W)
    t = jnp.einsum('oc,bcw->bow', w1, m_i) + b1[None]
    t = t * bn_scale[None] + bn_shift[None]
    t = jnp.clip(t, 0.0, 6.0)
    a = jnp.einsum('om,bmw->bow', w2, t) + b2[None]
    gate = jax.nn.sigmoid(a)                                        # (B, C_out, W)
    m_out = l_x * gate[:, :, None, :]
    return l_x + sig.reshape(B, 1, 1, 1) * m_out


if __name__ == "__main__":
    key = jax.random.PRNGKey(0)
    B, int_c, out_c, reduction = 2, 8, 64, 32
    H, W = 8, 16            # l_x spatial (H*W = 128 -> lane-dense flattened dim)
    Hh, Wh = 16, 8          # h_x spatial (W differs -> exercises interpolation)

    k1, k2, k3, kp = jax.random.split(key, 4)
    h_x = jax.random.normal(k1, (B, int_c, Hh, Wh), jnp.float32)
    l_x = jax.random.normal(k2, (B, out_c, H, W), jnp.float32)
    sig = jax.random.uniform(k3, (B,), jnp.float32)
    params = init_params(kp, int_c, out_c, reduction)

    # f32 path
    out = jax.block_until_ready(r_func_forward(h_x, l_x, sig, params))
    ref = _reference(h_x, l_x, sig, params)
    assert out.shape == (B, out_c, H, W)
    assert out.dtype == l_x.dtype
    assert jnp.allclose(out, ref, atol=1e-5, rtol=1e-5), "f32 kernel mismatch"

    # bf16 path: l_x kept in bf16 end-to-end (no wrapper upcast), gate math in f32.
    l_bf16 = l_x.astype(jnp.bfloat16)
    out_bf = jax.block_until_ready(r_func_forward(h_x, l_bf16, sig, params))
    ref_bf = _reference(h_x, l_bf16.astype(jnp.float32), sig, params)
    assert out_bf.dtype == jnp.bfloat16
    assert jnp.allclose(out_bf.astype(jnp.float32), ref_bf, atol=5e-2, rtol=5e-2), \
        "bf16 kernel mismatch"

    print("KERNEL_OK")
</pallas_src>

<mosaic_0001>
module attributes {stable_mosaic.version = 11 : i64} {
  func.func @_r_func_kernel(%arg0: i32, %arg1: i32, %arg2: memref<2xf32, #tpu.memory_space<smem>>, %arg3: memref<1x8x16xf32, #tpu.memory_space<vmem>>, %arg4: memref<1x64x128xf32, #tpu.memory_space<vmem>>, %arg5: memref<2x8xf32, #tpu.memory_space<vmem>>, %arg6: memref<2x1xf32, #tpu.memory_space<vmem>>, %arg7: memref<64x2xf32, #tpu.memory_space<vmem>>, %arg8: memref<64x1xf32, #tpu.memory_space<vmem>>, %arg9: memref<1x64x128xf32, #tpu.memory_space<vmem>>) attributes {dimension_semantics = [#tpu.dimension_semantics<parallel>, #tpu.dimension_semantics<parallel>], iteration_bounds = array<i64: 2, 1>, scalar_prefetch = 0 : i64, scratch_operands = 0 : i64, tpu.core_type = #tpu.core_type<tc>, window_params = [{transform_indices = @transform_0, window_bounds = array<i64: 2>}, {transform_indices = @transform_1, window_bounds = array<i64: 1, 8, 16>}, {transform_indices = @transform_2, window_bounds = array<i64: 1, 64, 128>}, {pipeline_mode = #tpu.pipeline_mode<synchronous>, transform_indices = @transform_3, window_bounds = array<i64: 2, 8>}, {pipeline_mode = #tpu.pipeline_mode<synchronous>, transform_indices = @transform_4, window_bounds = array<i64: 2, 1>}, {transform_indices = @transform_5, window_bounds = array<i64: 64, 2>}, {transform_indices = @transform_6, window_bounds = array<i64: 64, 1>}, {transform_indices = @transform_7, window_bounds = array<i64: 1, 64, 128>}]} {
    %c0 = arith.constant 0 : index
    %c0_0 = arith.constant 0 : index
    %c0_1 = arith.constant 0 : index
    %0 = vector.load %arg3[%c0, %c0_0, %c0_1] : memref<1x8x16xf32, #tpu.memory_space<vmem>>, vector<1x8x16xf32>
    %1 = vector.shape_cast %0 : vector<1x8x16xf32> to vector<8x16xf32>
    %c0_2 = arith.constant 0 : index
    %c0_3 = arith.constant 0 : index
    %2 = vector.load %arg5[%c0_2, %c0_3] : memref<2x8xf32, #tpu.memory_space<vmem>>, vector<2x8xf32>
    %cst = arith.constant dense<0.000000e+00> : vector<2x16xf32>
    %3 = tpu.matmul %2, %1, %cst {dimension_numbers = #tpu.dot_dimension_numbers<[1], [0], [0], [1], [0, 0, 1, 1], [], []>} : vector<2x8xf32>, vector<8x16xf32>, vector<2x16xf32> -> vector<2x16xf32>
    %c0_4 = arith.constant 0 : index
    %c0_5 = arith.constant 0 : index
    %4 = vector.load %arg6[%c0_4, %c0_5] : memref<2x1xf32, #tpu.memory_space<vmem>>, vector<2x1xf32>
    %5 = vector.broadcast %4 : vector<2x1xf32> to vector<2x16xf32>
    %6 = arith.addf %3, %5 : vector<2x16xf32>
    %cst_6 = arith.constant 0.000000e+00 : f32
    %cst_7 = arith.constant 6.000000e+00 : f32
    %7 = vector.broadcast %cst_6 : f32 to vector<2x16xf32>
    %8 = arith.maximumf %7, %6 : vector<2x16xf32>
    %9 = vector.broadcast %cst_7 : f32 to vector<2x16xf32>
    %10 = arith.minimumf %9, %8 : vector<2x16xf32>
    %c0_8 = arith.constant 0 : index
    %c0_9 = arith.constant 0 : index
    %11 = vector.load %arg7[%c0_8, %c0_9] : memref<64x2xf32, #tpu.memory_space<vmem>>, vector<64x2xf32>
    %cst_10 = arith.constant dense<0.000000e+00> : vector<64x16xf32>
    %12 = tpu.matmul %11, %10, %cst_10 {dimension_numbers = #tpu.dot_dimension_numbers<[1], [0], [0], [1], [0, 0, 1, 1], [], []>} : vector<64x2xf32>, vector<2x16xf32>, vector<64x16xf32> -> vector<64x16xf32>
    %c0_11 = arith.constant 0 : index
    %c0_12 = arith.constant 0 : index
    %13 = vector.load %arg8[%c0_11, %c0_12] : memref<64x1xf32, #tpu.memory_space<vmem>>, vector<64x1xf32>
    %14 = vector.broadcast %13 : vector<64x1xf32> to vector<64x16xf32>
    %15 = arith.addf %12, %14 : vector<64x16xf32>
    %16 = arith.negf %15 : vector<64x16xf32>
    %17 = math.exp %16 : vector<64x16xf32>
    %cst_13 = arith.constant 1.000000e+00 : f32
    %18 = vector.broadcast %cst_13 : f32 to vector<64x16xf32>
    %19 = arith.addf %18, %17 : vector<64x16xf32>
    %20 = arith.divf %18, %19 : vector<64x16xf32>
    %21 = arith.index_cast %arg0 : i32 to index
    %22 = memref.load %arg2[%21] : memref<2xf32, #tpu.memory_space<smem>>
    %23 = vector.broadcast %22 : f32 to vector<64x16xf32>
    %24 = arith.mulf %23, %20 : vector<64x16xf32>
    %cst_14 = arith.constant 1.000000e+00 : f32
    %25 = vector.broadcast %cst_14 : f32 to vector<64x16xf32>
    %26 = arith.addf %25, %24 : vector<64x16xf32>
    %27 = tpu.concatenate %26, %26, %26, %26, %26, %26, %26, %26 in 1 : vector<64x16xf32>, vector<64x16xf32>, vector<64x16xf32>, vector<64x16xf32>, vector<64x16xf32>, vector<64x16xf32>, vector<64x16xf32>, vector<64x16xf32> -> vector<64x128xf32>
    %c0_15 = arith.constant 0 : index
    %c0_16 = arith.constant 0 : index
    %c0_17 = arith.constant 0 : index
    %28 = vector.load %arg4[%c0_15, %c0_16, %c0_17] : memref<1x64x128xf32, #tpu.memory_space<vmem>>, vector<1x64x128xf32>
    %29 = vector.shape_cast %28 : vector<1x64x128xf32> to vector<64x128xf32>
    %30 = arith.mulf %29, %27 : vector<64x128xf32>
    %c0_18 = arith.constant 0 : index
    %c0_19 = arith.constant 0 : index
    %c0_20 = arith.constant 0 : index
    %31 = vector.load %arg9[%c0_18, %c0_19, %c0_20] : memref<1x64x128xf32, #tpu.memory_space<vmem>>, vector<1x64x128xf32>
    %32 = vector.shape_cast %31 : vector<1x64x128xf32> to vector<64x128xf32>
    %33 = vector.shape_cast %30 : vector<64x128xf32> to vector<1x64x128xf32>
    tpu.vector_store %arg9[%c0_18, %c0_19, %c0_20], %33 {strides = array<i32>} : memref<1x64x128xf32, #tpu.memory_space<vmem>>, vector<1x64x128xf32>,
    return
  }
  func.func @transform_0(%arg0: i32, %arg1: i32) -> i32 {
    %c0_i32 = arith.constant 0 : i32
    %c0_i32_0 = arith.constant 0 : i32
    return %c0_i32 : i32
  }
  func.func @transform_1(%arg0: i32, %arg1: i32) -> (i32, i32, i32) {
    %c0_i32 = arith.constant 0 : i32
    %c0_i32_0 = arith.constant 0 : i32
    %c0_i32_1 = arith.constant 0 : i32
    return %arg0, %c0_i32, %c0_i32_0 : i32, i32, i32
  }
  func.func @transform_2(%arg0: i32, %arg1: i32) -> (i32, i32, i32) {
    %c0_i32 = arith.constant 0 : i32
    %c0_i32_0 = arith.constant 0 : i32
    return %arg0, %arg1, %c0_i32 : i32, i32, i32
  }
  func.func @transform_3(%arg0: i32, %arg1: i32) -> (i32, i32) {
    %c0_i32 = arith.constant 0 : i32
    %c0_i32_0 = arith.constant 0 : i32
    %c0_i32_1 = arith.constant 0 : i32
    return %c0_i32, %c0_i32_0 : i32, i32
  }
  func.func @transform_4(%arg0: i32, %arg1: i32) -> (i32, i32) {
    %c0_i32 = arith.constant 0 : i32
    %c0_i32_0 = arith.constant 0 : i32
    %c0_i32_1 = arith.constant 0 : i32
    return %c0_i32, %c0_i32_0 : i32, i32
  }
  func.func @transform_5(%arg0: i32, %arg1: i32) -> (i32, i32) {
    %c0_i32 = arith.constant 0 : i32
    %c0_i32_0 = arith.constant 0 : i32
    return %arg1, %c0_i32 : i32, i32
  }
  func.func @transform_6(%arg0: i32, %arg1: i32) -> (i32, i32) {
    %c0_i32 = arith.constant 0 : i32
    %c0_i32_0 = arith.constant 0 : i32
    return %arg1, %c0_i32 : i32, i32
  }
  func.func @transform_7(%arg0: i32, %arg1: i32) -> (i32, i32, i32) {
    %c0_i32 = arith.constant 0 : i32
    %c0_i32_0 = arith.constant 0 : i32
    return %arg0, %arg1, %c0_i32 : i32, i32, i32
  }
}

</mosaic_0001>

<bundles_post_ra>
// kernel: tpu_custom_call.1
= control target key start
LH: loop header
LB: loop body
LE: loop exit
PB: predicated region body
PF: predicated region fallthrough
CT: control target
= control target key end

     0   :  { %s1986_s0 = inlined_call_operand.vmem [shape: f32[2], index: 0, kind: input, shape index: {}]   ;;  %s1987_s1 = inlined_call_operand.hbm [shape: f32[2,8,16], index: 1, kind: input, shape index: {}]   ;;  %s1988_s2 = inlined_call_operand.vmem [shape: f32[2,64,128], index: 2, kind: input, shape index: {}]   ;;  %s1989_s3 = inlined_call_operand.vmem [shape: f32[2,8], index: 3, kind: input, shape index: {}]   ;;  %s1990_s4 = inlined_call_operand.vmem [shape: f32[2,1], index: 4, kind: input, shape index: {}]   ;;  %s1991_s5 = inlined_call_operand.vmem [shape: f32[64,2], index: 5, kind: input, shape index: {}]   ;;  %s1992_s6 = inlined_call_operand.vmem [shape: f32[64,1], index: 6, kind: input, shape index: {}]   ;;  %s1993_s7 = inlined_call_operand.hbm [shape: f32[2,64,128], index: 7, kind: output, shape index: {}]  }
   0x1   :  { %1995 = sst [smem:[#allocation12_spill]] %s1986_s0 }
   0x2   :  { %12 = vsyncpa [#allocation5], 0 }
   0x3   :  { %13 = vsyncpa [#allocation3], 0 }
   0x4   :  { %15 = vsyncpa [#allocation3 + $0x1], 0 }
   0x5   :  { %16 = vsyncpa [#allocation4], 0 }
   0x6   :  { %18 = vsyncpa [#allocation4 + $0x1], 0  ;;  %s1504_s24 = smov 0   ;;  %s1506_s25 = smov 0  }
   0x7   :  { %s1508_s26 = smov 0   ;;  %s1510_s27 = smov 0  }
   0x8   :  { %s1512_s28 = smov 0   ;;  %s1514_s29 = smov 0  }
   0x9 LB: > { %s1160_s30 = sadd.s32 4294967295, %s1451_s29   ;;  %s1161_s8 = sadd.s32 4294967294, %s1451_s29   ;;  %s1451_s29 = sphi %s1514_s29, %s24_s29   ;;  %s1447_s28 = sphi %s1512_s28, %s2010_s28   ;;  %s1443_s27 = sphi %s1510_s27, %s2009_s27   ;;  %s1439_s26 = sphi %s1508_s26, %s2008_s26   ;;  %s1435_s25 = sphi %s1506_s25, %s2007_s25   ;;  %s1431_s24 = sphi %s1504_s24, %s2006_s24  }
   0xa   : > { %p77_p0 = scmp.ne.s32.totalorder %s1435_s25, %s1431_s24  ;;  %p1538_p1 = scmp.eq.s32.totalorder %s1160_s30, 0 }
   0xb   : > { %p1542_p2 = scmp.eq.s32.totalorder %s1160_s30, 1  ;;  %p231_p3 = scmp.eq.s32.totalorder %s1161_s8, 1 }
   0xc   : > { %p1548_p4 = por %p1538_p1, %p77_p0  ;;  %p1162_p5 = scmp.ge.s32.totalorder %s1451_s29, 1 }
   0xd   : > { %p1553_p6 = por %p231_p3, %p77_p0  ;;  %p238_p7 = scmp.lt.s32.totalorder %s1451_s29, 3 }
   0xe   : > { %s2000_s0 = sld [smem:[#allocation12_spill]]  ;;  %s36_s17 = sadd.s32 1, %s1447_s28 }
   0xf   : > { %p1561_p8 = pnand %p1162_p5, %p238_p7  ;;  %s64_s18 = sadd.s32 1, %s1439_s26 }
  0x10   : > { %p38_p12 = scmp.ge.s32.totalorder %s36_s17, 2  ;;  %s1453_s19 = smov [#allocation2]  }
  0x11   : > { %p1210_p10 = pneg %p1561_p8  ;;  %p71_p13 = scmp.ne.s32.totalorder %s1439_s26, %s1435_s25 }
  0x12   : > { %s2012_s17 = smov (%p38_p12, %s36_s17), 0  ;;  %p72_p0 = scmp.eq.s32.totalorder %s1451_s29, 0 }
  0x13   : > { %p1211_p11 = pnand %p1210_p10, %p1538_p1  ;;  %2002 = sst [smem:[#allocation11_spill]] %s2012_s17 }
  0x14   : > { %s250_s15 = sshll.u32 %s2000_s0, 4  ;;  %s61_s20 = ssub.s32 %s1447_s28, %s2012_s17  ;;  %s251_s15 = int_to_ptr.vmem [resolvable:$true] %s250_s15 }
  0x15   : > { %1213 = dma.vmem_to_smem (!%p1211_p11), %s251_s15, 16, %s1453_s19, [#allocation5]  }
  0x16   : > { %p1223_p3 = scmp.lt.s32.totalorder %s1451_s29, 2  ;;  %p62_p5 = scmp.eq.s32.totalorder %s61_s20, 0 }
  0x17   : > { %p73_p7 = por %p72_p0, %p71_p13  ;;  %p1582_p9 = por %p1542_p2, %p71_p13 }
  0x18   : > { %s285_s22 = sand.u32 1, %s1439_s26   ;;  %s1168_s8 = sshll.u32 %s1447_s28, 3 }
  0x19   : > { %s1588_s23 = scalar_select %p62_p5, %s1439_s26, %s64_s18  }
  0x1a   : > { %s1167_s30 = sshll.u32 %s285_s22, 3  ;;  %s293_s15 = scalar_lea.hbm %s1987_s1, %s1168_s8 }
  0x1b   : > { %s289_s19 = scalar_lea.vmem [#allocation6], %s1167_s30  ;;  %s295_s17 = sshll.u32 %s293_s15, 4  ;;  %s296_s17 = int_to_ptr.hbm [resolvable:$true] %s295_s17 }
  0x1c   : > { %s297_s0 = sshll.u32 %s289_s19, 4  ;;  %p1215_p10 = pnand %p1223_p3, %p73_p7  ;;  %s298_s0 = int_to_ptr.vmem [resolvable:$true] %s297_s0 }
  0x1d   : > { %s286_s10 = scalar_lea.sflag [#allocation3], %s285_s22  ;;  %319 = sbr.rel (%p1561_p8) target bundleno = 604 (0x25c), region = 48 }
  0x1e   : > { %1217 = dma.hbm_to_vmem [thread:$0]  (!%p1215_p10), %s296_s17, 128, %s298_s0, %s286_s10  }
  0x22   : > { %1418 = dma.done.wait (%p1538_p1), [#allocation5], 16  }
  0x23   : > { %1420 = vsyncadd (%p1538_p1), [#allocation5], 4294967280  ;;  %s1603_s18 = sand.u32 1, %s1435_s25  }
  0x24   : > { %s1171_s20 = sshll.u32 %s1603_s18, 3  ;;  %s327_s30 = scalar_lea.sflag [#allocation3], %s1603_s18 }
  0x25   : > { %s330_s8 = scalar_lea.vmem [#allocation6], %s1171_s20 }
  0x26   : > { %1422 = dma.done.wait (%p1548_p4), %s327_s30, 128  }
  0x27   : > { %1424 = vsyncadd (%p1548_p4), %s327_s30, 4294967168 }
  0x28   : > { %336 = sfence }
  0x29   : > { %v405_v0 = vld [vmem:[%s330_s8] sm:$0xff]  ;;  %v1454_v3 = vmov 0   ;;  %vm413_vm0 = vcmask 64512   ;;  %v449_v7 = vld [vmem:[%s1992_s6 + $0x10] sm:$0xff]  ;;  %v450_v9 = vld [vmem:[%s1992_s6 + $0x18] sm:$0xff]  ;;  %vm520_vm1 = vcmask 1041408  }
  0x2a   : > { %v407_v1 = vld [vmem:[%s1990_s4] sm:$0x3]  ;;  %1285 = vset.pattern.permute.xlu0 %v1454_v3  ;;  %432 = vmatpush.msra.mxu0 %v405_v0  ;;  %v452_v5 = vld [vmem:[%s1992_s6 + $0x28] sm:$0xff]  ;;  %v453_v8 = vld [vmem:[%s1992_s6 + $0x30] sm:$0xff]  ;;  %vm495_vm2 = vcmask 15360   ;;  %s717_s15 = sld [smem:[#allocation2 + %s1443_s27]] }
  0x2b   : > { %v406_v2 = vld [vmem:[%s1989_s3] sm:$0x3]  ;;  %410 = vperm.xlu0 %1285, %v407_v1   ;;  %1286 = vset.pattern.permute.xlu1 %v1454_v3  ;;  %v448_v6 = vld [vmem:[%s1992_s6 + $0x8] sm:$0xff]  ;;  %v442_v17 = vld [vmem:[%s1991_s5 + $0x18] sm:$0xff]  ;;  %s1455_s19 = smov 48   ;;  %s1456_s10 = smov 32  }
  0x2c   : > { %1175 = vmatmul.msk.f32.vlgmr.msra.gmra.mxu0 %vm413_vm0, %v406_v2  ;;  %1287 = vset.pattern.permute.xlu2 %v1454_v3  ;;  %v447_v4 = vld [vmem:[%s1992_s6] sm:$0xff]  ;;  %v445_v18 = vld [vmem:[%s1991_s5 + $0x30] sm:$0xff]  ;;  %v454_v19 = vld [vmem:[%s1992_s6 + $0x38] sm:$0xff]  ;;  %s1457_s20 = smov 16   ;;  %s1458_s30 = smov 96  }
  0x2d   : > { %462 = vperm.xlu1 %1286, %v448_v6   ;;  %472 = vperm.xlu2 %1287, %v450_v9   ;;  %v451_v10 = vld [vmem:[%s1992_s6 + $0x20] sm:$0xff]  ;;  %v440_v20 = vld [vmem:[%s1991_s5 + $0x8] sm:$0xff]  ;;  %v446_v22 = vld [vmem:[%s1991_s5 + $0x38] sm:$0xff]  ;;  %s1459_s8 = smov 80   ;;  %s1460_s0 = smov 64  }
  0x2e   : > { %v439_v16 = vld [vmem:[%s1991_s5] sm:$0xff]  ;;  %v441_v23 = vld [vmem:[%s1991_s5 + $0x10] sm:$0xff]  ;;  %v444_v24 = vld [vmem:[%s1991_s5 + $0x28] sm:$0xff]  ;;  %s1461_s16 = smov 112   ;;  %p383_p1 = scmp.lt.s32.totalorder %s1443_s27, 1 }
  0x2f   : > { %v443_v21 = vld [vmem:[%s1991_s5 + $0x20] sm:$0xff]  ;;  %s1172_s14 = sshll.u32 %s1603_s18, 6  ;;  %s1385_s22 = scalar_lea.hbm %s1993_s7, 128 }
  0x30   : > { %v1679_v60 = vstv %s717_s15  ;;  %s384_s9 = scalar_select %p383_p1, %s1443_s27, 1 }
  0x31   : > { %s1854_s15 = scalar_lea.vmem [#allocation7], %s1172_s14 }
  0x32   : > { %s1198_s17 = sshll.u32 %s384_s9, 6 }
  0x33   : > { %457 = vperm.xlu0 %1285, %v447_v4   ;;  %s1841_s13 = scalar_lea.vmem %s1988_s2, %s1198_s17 }
  0x35   : > { %467 = vperm.xlu1 %1286, %v449_v7   ;;  %477 = vperm.xlu2 %1287, %v451_v10  }
  0x3b   : > { %482 = vperm.xlu0 %1285, %v452_v5  }
  0x3d   : > { %487 = vperm.xlu1 %1286, %v453_v8   ;;  %492 = vperm.xlu2 %1287, %v454_v19  }
  0x87   : > { %v473_v32 = vpop.permute.xlu2 %472 }
  0x8f   : > { %v478_v7 = vpop.permute.xlu2 %477 }
  0x9d   : > { %v411_v11 = vpop.permute.xlu0 %410 }
  0x9f   : > { %v463_v25 = vpop.permute.xlu1 %462 }
  0xa5   : > { %v458_v27 = vpop.permute.xlu0 %457 }
  0xa7   : > { %v468_v26 = vpop.permute.xlu1 %467 }
  0xa9   : > { %v434_v12 = vpop.f32.mrf.mxu0 }
  0xaa   : > { %v435_v13 = vadd.f32 %v434_v12, %v411_v11 }
  0xac   : > { %v437_v14 = vmax.f32 %v435_v13, 0.0 }
  0xae   : > { %v438_v15 = vmin.f32 %v437_v14, 6.0 }
  0xaf   : > { %v488_v31 = vpop.permute.xlu1 %487 }
  0xb0   : > { %1176 = vmatpush.msk.msra.mxu1 %vm520_vm1, %v438_v15  ;;  %1200 = vmatpush.msk.msra.mxu2 %vm520_vm1, %v438_v15 }
  0xb1   : > { %1201 = vmatpush.msk.msra.mxu3 %vm520_vm1, %v438_v15  ;;  %1177 = vmatmul.msk.f32.vlgmr.msra.gmra.mxu1 %vm495_vm2, %v439_v16 }
  0xb2   : > { %1180 = vmatmul.msk.f32.vlgmr.msra.gmra.mxu2 %vm495_vm2, %v442_v17  ;;  %1183 = vmatmul.msk.f32.vlgmr.msra.gmra.mxu3 %vm495_vm2, %v445_v18 }
  0xb9   : > { %1178 = vmatmul.msk.f32.gmra.mxu1 %vm495_vm2, %v440_v20 }
  0xba   : > { %1181 = vmatmul.msk.f32.gmra.mxu2 %vm495_vm2, %v443_v21  ;;  %1184 = vmatmul.msk.f32.gmra.mxu3 %vm495_vm2, %v446_v22 }
  0xc1   : > { %1179 = vmatmul.msk.f32.gmra.mxu1 %vm495_vm2, %v441_v23 }
  0xc2   : > { %1182 = vmatmul.msk.f32.gmra.mxu2 %vm495_vm2, %v444_v24 }
 0x12e   : > { %v541_v28 = vpop.f32.mrf.mxu1 }
 0x12f   : > { %v542_v29 = vadd.f32 %v541_v28, %v458_v27 }
 0x131   : > { %v1185_v30 = vmul.f32 -1.442695, %v542_v29 }
 0x133   : > { %1288 = vpow2.f32 %v1185_v30 }
 0x135   : > { %v550_v33 = vpop.f32.mrf.mxu2  ;;  %v559_v34 = vpop.f32.mrf.mxu3 }
 0x136   : > { %v551_v35 = vadd.f32 %v550_v33, %v473_v32  ;;  %v560_v36 = vadd.f32 %v559_v34, %v488_v31  ;;  %v544_v37 = vpop.f32.mrf.mxu1 }
 0x137   : > { %v545_v55 = vadd.f32 %v544_v37, %v463_v25 }
 0x138   : > { %v1188_v38 = vmul.f32 -1.442695, %v551_v35  ;;  %v1191_v39 = vmul.f32 -1.442695, %v560_v36 }
 0x139   : > { %v1289_v40 = vpop.eup %1288  ;;  %v1186_v63 = vmul.f32 -1.442695, %v545_v55 }
 0x13a   : > { %v589_v41 = vadd.f32 1.0, %v1289_v40  ;;  %1290 = vpow2.f32 %v1188_v38 }
 0x13b   : > { %1292 = vpow2.f32 %v1191_v39 }
 0x13c   : > { %1294 = vrcp.f32 %v589_v41  ;;  %v608_v52 = vand.u32 2147483648, %v589_v41  ;;  %v606_v54 = vand.u32 2147483647, %v589_v41  ;;  %vm602_vm4 = vweird.f32 %v589_v41 }
 0x13d   : > { %v553_v13 = vpop.f32.mrf.mxu2  ;;  %v562_v28 = vpop.f32.mrf.mxu3 }
 0x13e   : > { %v547_v42 = vpop.f32.mrf.mxu1  ;;  %v609_v59 = vor.u32 1.1754944e-38, %v608_v52  ;;  %vm607_vm6 = vcmp.eq.f32.partialorder %v606_v54, 8.507059e+37  ;;  %v554_v18 = vadd.f32 %v553_v13, %v478_v7 }
 0x13f   : > { %v548_v44 = vadd.f32 %v547_v42, %v468_v26  ;;  %v493_v26 = vpop.permute.xlu2 %492 }
 0x140   : > { %v1291_v43 = vpop.eup %1290  ;;  %v1189_v27 = vmul.f32 -1.442695, %v554_v18  ;;  %v563_v32 = vadd.f32 %v562_v28, %v493_v26 }
 0x141   : > { %v1293_v45 = vpop.eup %1292  ;;  %v592_v46 = vadd.f32 1.0, %v1291_v43  ;;  %v1187_v50 = vmul.f32 -1.442695, %v548_v44 }
 0x142   : > { %v1295_v47 = vpop.eup %1294  ;;  %v1674_v48 = vadd.f32 1.0, %v1293_v45  ;;  %v1192_v42 = vmul.f32 -1.442695, %v563_v32 }
 0x143   : > { %v598_v49 = vmul.f32 %v1295_v47, %v589_v41  ;;  %1296 = vrcp.f32 %v592_v46  ;;  %vm603_vm3 = vweird.f32 %v1295_v47  ;;  %vm647_vm7 = vweird.f32 %v592_v46 }
 0x144   : > { %1298 = vrcp.f32 %v1674_v48  ;;  %vm604_vm5 = vmor %vm602_vm4, %vm603_vm3  ;;  %v653_v11 = vand.u32 2147483648, %v592_v46  ;;  %v651_v12 = vand.u32 2147483647, %v592_v46  ;;  %v698_v22 = vand.u32 2147483648, %v1674_v48 }
 0x145   : > { %v599_v51 = vsub.f32 1.0, %v598_v49  ;;  %1300 = vpow2.f32 %v1187_v50  ;;  %vm692_vm12 = vweird.f32 %v1674_v48  ;;  %v696_v25 = vand.u32 2147483647, %v1674_v48 }
 0x146   : > { %1302 = vpow2.f32 %v1186_v63  ;;  %v654_v17 = vor.u32 1.1754944e-38, %v653_v11  ;;  %vm652_vm10 = vcmp.eq.f32.partialorder %v651_v12, 8.507059e+37  ;;  %v699_v31 = vor.u32 1.1754944e-38, %v698_v22 }
 0x147   : > { %v600_v53 = vmul.f32 %v1295_v47, %v599_v51  ;;  %vm697_vm14 = vcmp.eq.f32.partialorder %v696_v25, 8.507059e+37 }
 0x149   : > { %v1297_v56 = vpop.eup %1296  ;;  %v601_v57 = vadd.f32 %v1295_v47, %v600_v53 }
 0x14a   : > { %v1677_v58 = vpop.eup %1298  ;;  %v643_v61 = vmul.f32 %v1297_v56, %v592_v46  ;;  %vm648_vm8 = vweird.f32 %v1297_v56 }
 0x14b   : > { %v605_v62 = vsel %vm604_vm5, %v1295_v47, %v601_v57  ;;  %v688_v3 = vmul.f32 %v1677_v58, %v1674_v48  ;;  %v1301_v4 = vpop.eup %1300  ;;  %vm649_vm9 = vmor %vm647_vm7, %vm648_vm8  ;;  %vm693_vm11 = vweird.f32 %v1677_v58 }
 0x14c   : > { %v610_v0 = vsel %vm607_vm6, %v609_v59, %v605_v62  ;;  %v644_v1 = vsub.f32 1.0, %v643_v61  ;;  %v1686_v10 = vadd.f32 1.0, %v1301_v4  ;;  %v1303_v14 = vpop.eup %1302  ;;  %vm694_vm13 = vmor %vm692_vm12, %vm693_vm11 }
 0x14d   : > { %v719_v2 = vmul.f32 %v1679_v60, %v610_v0  ;;  %v689_v9 = vsub.f32 1.0, %v688_v3  ;;  %v1696_v20 = vadd.f32 1.0, %v1303_v14 }
 0x14e   : > { %v645_v5 = vmul.f32 %v1297_v56, %v644_v1  ;;  %1304 = vrcp.f32 %v1686_v10  ;;  %v638_v35 = vand.u32 2147483648, %v1686_v10  ;;  %v636_v38 = vand.u32 2147483647, %v1686_v10 }
 0x14f   : > { %v1684_v6 = vadd.f32 1.0, %v719_v2  ;;  %v690_v16 = vmul.f32 %v1677_v58, %v689_v9  ;;  %1306 = vrcp.f32 %v1696_v20  ;;  %vm632_vm0 = vweird.f32 %v1686_v10 }
 0x150   : > { %v646_v8 = vadd.f32 %v1297_v56, %v645_v5  ;;  %1308 = vpow2.f32 %v1189_v27  ;;  %v639_v43 = vor.u32 1.1754944e-38, %v638_v35  ;;  %vm637_vm2 = vcmp.eq.f32.partialorder %v636_v38, 8.507059e+37 }
 0x151   : > { %791 = vrot.lane.b32.xlu1 %v1684_v6, %s1455_s19  ;;  %767 = vrot.lane.b32.xlu2 %v1684_v6, %s1456_s10  ;;  %v691_v21 = vadd.f32 %v1677_v58, %v690_v16  ;;  %1310 = vpow2.f32 %v1192_v42  ;;  %v623_v57 = vand.u32 2147483648, %v1696_v20  ;;  %vm617_vm4 = vweird.f32 %v1696_v20 }
 0x152   : > { %743 = vrot.lane.b32.xlu0 %v1684_v6, %s1457_s20  ;;  %v650_v15 = vsel %vm649_vm9, %v1297_v56, %v646_v8 }
 0x153   : > { %v655_v19 = vsel %vm652_vm10, %v654_v17, %v650_v15  ;;  %v695_v30 = vsel %vm694_vm13, %v1677_v58, %v691_v21  ;;  %v621_v58 = vand.u32 2147483647, %v1696_v20  ;;  %v624_v62 = vor.u32 1.1754944e-38, %v623_v57  ;;  %v483_v21 = vpop.permute.xlu0 %482 }
 0x154   : > { %v1305_v23 = vpop.eup %1304  ;;  %v722_v24 = vmul.f32 %v1679_v60, %v655_v19  ;;  %v700_v36 = vsel %vm697_vm14, %v699_v31, %v695_v30  ;;  %v556_v19 = vpop.f32.mrf.mxu2 }
 0x155   : > { %v628_v29 = vmul.f32 %v1305_v23, %v1686_v10  ;;  %vm633_vm15 = vweird.f32 %v1305_v23  ;;  %v1307_v39 = vpop.eup %1306  ;;  %v725_v41 = vmul.f32 %v1679_v60, %v700_v36  ;;  %vm622_vm6 = vcmp.eq.f32.partialorder %v621_v58, 8.507059e+37 }
 0x156   : > { %v1715_v34 = vadd.f32 1.0, %v722_v24  ;;  %vm634_vm1 = vmor %vm632_vm0, %vm633_vm15  ;;  %v1309_v45 = vpop.eup %1308  ;;  %v613_v46 = vmul.f32 %v1307_v39, %v1696_v20  ;;  %vm618_vm3 = vweird.f32 %v1307_v39  ;;  %v557_v24 = vadd.f32 %v556_v19, %v483_v21 }
 0x157   : > { %v629_v33 = vsub.f32 1.0, %v628_v29  ;;  %v1731_v49 = vadd.f32 1.0, %v725_v41  ;;  %v593_v50 = vadd.f32 1.0, %v1309_v45  ;;  %v1311_v52 = vpop.eup %1310  ;;  %vm619_vm5 = vmor %vm617_vm4, %vm618_vm3  ;;  %vm911_vm3 = vcmask 130048  }
 0x158   : > { %v614_v51 = vsub.f32 1.0, %v613_v46  ;;  %v596_v54 = vadd.f32 1.0, %v1311_v52  ;;  %v1190_v27 = vmul.f32 -1.442695, %v557_v24  ;;  %vm920_vm4 = vcmask 261120  }
 0x159   : > { %863 = vrot.lane.b32.xlu1 %v1684_v6, %s1458_s30  ;;  %839 = vrot.lane.b32.xlu2 %v1684_v6, %s1459_s8  ;;  %v630_v37 = vmul.f32 %v1305_v23, %v629_v33  ;;  %1312 = vrcp.f32 %v593_v50  ;;  %v668_v9 = vand.u32 2147483648, %v593_v50  ;;  %vm662_vm8 = vweird.f32 %v593_v50 }
 0x15a   : > { %815 = vrot.lane.b32.xlu0 %v1684_v6, %s1460_s0  ;;  %v615_v53 = vmul.f32 %v1307_v39, %v614_v51  ;;  %1314 = vrcp.f32 %v596_v54  ;;  %v666_v10 = vand.u32 2147483647, %v593_v50  ;;  %v713_v16 = vand.u32 2147483648, %v596_v54 }
 0x15b   : > { %v631_v40 = vadd.f32 %v1305_v23, %v630_v37  ;;  %v669_v13 = vor.u32 1.1754944e-38, %v668_v9  ;;  %vm707_vm12 = vweird.f32 %v596_v54  ;;  %v711_v18 = vand.u32 2147483647, %v596_v54 }
 0x15c   : > { %v616_v55 = vadd.f32 %v1307_v39, %v615_v53  ;;  %vm667_vm10 = vcmp.eq.f32.partialorder %v666_v10, 8.507059e+37  ;;  %v714_v22 = vor.u32 1.1754944e-38, %v713_v16  ;;  %1316 = vpow2.f32 %v1190_v27 }
 0x15d   : > { %v635_v44 = vsel %vm634_vm1, %v1305_v23, %v631_v40  ;;  %vm712_vm14 = vcmp.eq.f32.partialorder %v711_v18, 8.507059e+37 }
 0x15e   : > { %v640_v47 = vsel %vm637_vm2, %v639_v43, %v635_v44  ;;  %v620_v59 = vsel %vm619_vm5, %v1307_v39, %v616_v55  ;;  %vm929_vm5 = vcmask 392192  }
 0x15f   : > { %v1729_v48 = vmul.f32 %v1679_v60, %v640_v47  ;;  %v1313_v56 = vpop.eup %1312  ;;  %v625_v63 = vsel %vm622_vm6, %v624_v62, %v620_v59  ;;  %vm938_vm6 = vcmask 523264   ;;  %v974_v59 = vld [vmem:[%s1841_s13] sm:$0xff] }
 0x160   : > { %v658_v61 = vmul.f32 %v1313_v56, %v593_v50  ;;  %v1315_v1 = vpop.eup %1314  ;;  %v720_v2 = vmul.f32 %v1679_v60, %v625_v63  ;;  %vm663_vm7 = vweird.f32 %v1313_v56 }
 0x161   : > { %797 = vrot.lane.b32.xlu1 %v1715_v34, %s1455_s19  ;;  %773 = vrot.lane.b32.xlu2 %v1715_v34, %s1456_s10  ;;  %v703_v4 = vmul.f32 %v1315_v1, %v596_v54  ;;  %vm664_vm9 = vmor %vm662_vm8, %vm663_vm7  ;;  %vm708_vm11 = vweird.f32 %v1315_v1  ;;  %v1800_v35 = vadd.f32 1.0, %v1729_v48  ;;  %vm947_vm7 = vcmask 654336  }
 0x162   : > { %887 = vrot.lane.b32.xlu0 %v1684_v6, %s1461_s16  ;;  %v659_v0 = vsub.f32 1.0, %v658_v61  ;;  %v1755_v5 = vadd.f32 1.0, %v720_v2  ;;  %vm709_vm13 = vmor %vm707_vm12, %vm708_vm11  ;;  %v1317_v29 = vpop.eup %1316  ;;  %vm956_vm8 = vcmask 785408  }
 0x163   : > { %v704_v8 = vsub.f32 1.0, %v703_v4  ;;  %v594_v30 = vadd.f32 1.0, %v1317_v29 }
 0x164   : > { %v660_v3 = vmul.f32 %v1313_v56, %v659_v0 }
 0x165   : > { %v705_v12 = vmul.f32 %v1315_v1, %v704_v8  ;;  %1318 = vrcp.f32 %v594_v30  ;;  %v683_v40 = vand.u32 2147483648, %v594_v30  ;;  %vm677_vm0 = vweird.f32 %v594_v30 }
 0x166   : > { %v661_v7 = vadd.f32 %v1313_v56, %v660_v3  ;;  %v681_v41 = vand.u32 2147483647, %v594_v30 }
 0x167   : > { %v706_v15 = vadd.f32 %v1315_v1, %v705_v12  ;;  %v684_v44 = vor.u32 1.1754944e-38, %v683_v40 }
 0x168   : > { %v665_v11 = vsel %vm664_vm9, %v1313_v56, %v661_v7  ;;  %vm682_vm2 = vcmp.eq.f32.partialorder %v681_v41, 8.507059e+37  ;;  %vm965_vm9 = vcmask 916480  }
 0x169   : > { %803 = vrot.lane.b32.xlu1 %v1731_v49, %s1455_s19  ;;  %779 = vrot.lane.b32.xlu2 %v1731_v49, %s1456_s10  ;;  %v670_v14 = vsel %vm667_vm10, %v669_v13, %v665_v11  ;;  %v710_v20 = vsel %vm709_vm13, %v1315_v1, %v706_v15 }
 0x16a   : > { %749 = vrot.lane.b32.xlu0 %v1715_v34, %s1457_s20  ;;  %v723_v17 = vmul.f32 %v1679_v60, %v670_v14  ;;  %v715_v25 = vsel %vm712_vm14, %v714_v22, %v710_v20 }
 0x16b   : > { %v726_v26 = vmul.f32 %v1679_v60, %v715_v25  ;;  %v1319_v31 = vpop.eup %1318 }
 0x16c   : > { %v1770_v23 = vadd.f32 1.0, %v723_v17  ;;  %v673_v33 = vmul.f32 %v1319_v31, %v594_v30  ;;  %vm678_vm15 = vweird.f32 %v1319_v31 }
 0x16d   : > { %v1779_v28 = vadd.f32 1.0, %v726_v26  ;;  %vm679_vm1 = vmor %vm677_vm0, %vm678_vm15  ;;  %v977_v26 = vld [vmem:[%s1841_s13 + $0x18] sm:$0xff] }
 0x16e   : > { %v674_v36 = vsub.f32 1.0, %v673_v33 }
 0x170   : > { %v675_v38 = vmul.f32 %v1319_v31, %v674_v36 }
 0x171   : > { %869 = vrot.lane.b32.xlu1 %v1715_v34, %s1458_s30  ;;  %845 = vrot.lane.b32.xlu2 %v1715_v34, %s1459_s8 }
 0x172   : > { %755 = vrot.lane.b32.xlu0 %v1731_v49, %s1457_s20  ;;  %v676_v39 = vadd.f32 %v1319_v31, %v675_v38 }
 0x174   : > { %v680_v43 = vsel %vm679_vm1, %v1319_v31, %v676_v39 }
 0x175   : > { %v685_v45 = vsel %vm682_vm2, %v684_v44, %v680_v43 }
 0x176   : > { %v724_v46 = vmul.f32 %v1679_v60, %v685_v45  ;;  %v975_v45 = vld [vmem:[%s1841_s13 + $0x8] sm:$0xff] }
 0x178   : > { %v1824_v51 = vadd.f32 1.0, %v724_v46 }
 0x179   : > { %875 = vrot.lane.b32.xlu1 %v1731_v49, %s1458_s30  ;;  %851 = vrot.lane.b32.xlu2 %v1731_v49, %s1459_s8 }
 0x17a   : > { %821 = vrot.lane.b32.xlu0 %v1715_v34, %s1460_s0 }
 0x181   : > { %745 = vrot.lane.b32.xlu1 %v1755_v5, %s1457_s20  ;;  %793 = vrot.lane.b32.xlu2 %v1755_v5, %s1455_s19 }
 0x182   : > { %827 = vrot.lane.b32.xlu0 %v1731_v49, %s1460_s0 }
 0x189   : > { %817 = vrot.lane.b32.xlu1 %v1755_v5, %s1460_s0  ;;  %865 = vrot.lane.b32.xlu2 %v1755_v5, %s1458_s30 }
 0x18a   : > { %893 = vrot.lane.b32.xlu0 %v1715_v34, %s1461_s16 }
 0x191   : > { %889 = vrot.lane.b32.xlu1 %v1755_v5, %s1461_s16  ;;  %799 = vrot.lane.b32.xlu2 %v1770_v23, %s1455_s19 }
 0x192   : > { %769 = vrot.lane.b32.xlu0 %v1755_v5, %s1456_s10 }
 0x199   : > { %751 = vrot.lane.b32.xlu1 %v1770_v23, %s1457_s20  ;;  %805 = vrot.lane.b32.xlu2 %v1779_v28, %s1455_s19 }
 0x19a   : > { %841 = vrot.lane.b32.xlu0 %v1755_v5, %s1459_s8 }
 0x1a1   : > { %757 = vrot.lane.b32.xlu1 %v1779_v28, %s1457_s20  ;;  %871 = vrot.lane.b32.xlu2 %v1770_v23, %s1458_s30 }
 0x1a2   : > { %775 = vrot.lane.b32.xlu0 %v1770_v23, %s1456_s10 }
 0x1a9   : > { %823 = vrot.lane.b32.xlu1 %v1770_v23, %s1460_s0  ;;  %877 = vrot.lane.b32.xlu2 %v1779_v28, %s1458_s30 }
 0x1aa   : > { %781 = vrot.lane.b32.xlu0 %v1779_v28, %s1456_s10 }
 0x1ab   : > { %v768_v32 = vpop.permute.xlu2 %767 }
 0x1b1   : > { %829 = vrot.lane.b32.xlu1 %v1779_v28, %s1460_s0  ;;  %747 = vrot.lane.b32.xlu2 %v1800_v35, %s1457_s20 }
 0x1b2   : > { %847 = vrot.lane.b32.xlu0 %v1770_v23, %s1459_s8 }
 0x1b3   : > { %v840_v37 = vpop.permute.xlu2 %839 }
 0x1b9   : > { %895 = vrot.lane.b32.xlu1 %v1770_v23, %s1461_s16  ;;  %819 = vrot.lane.b32.xlu2 %v1800_v35, %s1460_s0 }
 0x1ba   : > { %853 = vrot.lane.b32.xlu0 %v1779_v28, %s1459_s8 }
 0x1bb   : > { %v1814_v42 = vpop.permute.xlu2 %773 }
 0x1c1   : > { %771 = vrot.lane.b32.xlu1 %v1800_v35, %s1456_s10  ;;  %891 = vrot.lane.b32.xlu2 %v1800_v35, %s1461_s16 }
 0x1c2   : > { %795 = vrot.lane.b32.xlu0 %v1800_v35, %s1455_s19 }
 0x1c3   : > { %v792_v47 = vpop.permute.xlu1 %791  ;;  %v780_v48 = vpop.permute.xlu2 %779 }
 0x1c4   : > { %v744_v50 = vpop.permute.xlu0 %743 }
 0x1c5   : > { %v912_v52 = vsel %vm911_vm3, %v1684_v6, %v744_v50 }
 0x1c6   : > { %v921_v60 = vsel %vm920_vm4, %v912_v52, %v768_v32 }
 0x1c7   : > { %v930_v6 = vsel %vm929_vm5, %v921_v60, %v792_v47 }
 0x1c9   : > { %843 = vrot.lane.b32.xlu1 %v1800_v35, %s1459_s8  ;;  %753 = vrot.lane.b32.xlu2 %v1824_v51, %s1457_s20 }
 0x1ca   : > { %867 = vrot.lane.b32.xlu0 %v1800_v35, %s1458_s30 }
 0x1cb   : > { %v864_v53 = vpop.permute.xlu1 %863  ;;  %v846_v54 = vpop.permute.xlu2 %845 }
 0x1cc   : > { %v816_v55 = vpop.permute.xlu0 %815 }
 0x1cd   : > { %v939_v56 = vsel %vm938_vm6, %v930_v6, %v816_v55 }
 0x1ce   : > { %v948_v57 = vsel %vm947_vm7, %v939_v56, %v840_v37 }
 0x1cf   : > { %v957_v61 = vsel %vm956_vm8, %v948_v57, %v864_v53 }
 0x1d1   : > { %777 = vrot.lane.b32.xlu1 %v1824_v51, %s1456_s10  ;;  %825 = vrot.lane.b32.xlu2 %v1824_v51, %s1460_s0  ;;  %s999_s0 = scalar_lea.sflag [#allocation4], %s1603_s18 }
 0x1d2   : > { %801 = vrot.lane.b32.xlu0 %v1824_v51, %s1455_s19  ;;  %s1199_s19 = sshll.u32 %s1443_s27, 6  ;;  %s1013_s27 = sshll.u32 %s1854_s15, 4  ;;  %s1014_s27 = int_to_ptr.vmem [resolvable:$true] %s1013_s27 }
 0x1d3   : > { %v798_v58 = vpop.permute.xlu1 %797  ;;  %v852_v63 = vpop.permute.xlu2 %851 }
 0x1d4   : > { %v888_v62 = vpop.permute.xlu0 %887 }
 0x1d5   : > { %v966_v0 = vsel %vm965_vm9, %v957_v61, %v888_v62 }
 0x1d6   : > { %v982_v1 = vmul.f32 %v974_v59, %v966_v0 }
 0x1d8   : > { %990 = vst [vmem:[%s1854_s15] sm:$0xff] %v982_v1 }
 0x1d9   : > { %849 = vrot.lane.b32.xlu1 %v1824_v51, %s1459_s8  ;;  %897 = vrot.lane.b32.xlu2 %v1824_v51, %s1461_s16 }
 0x1da   : > { %873 = vrot.lane.b32.xlu0 %v1824_v51, %s1458_s30  ;;  %s1012_s30 = scalar_lea.hbm %s1993_s7, %s1199_s19 }
 0x1db   : > { %v804_v2 = vpop.permute.xlu1 %803  ;;  %v794_v4 = vpop.permute.xlu2 %793  ;;  %s1015_s8 = sshll.u32 %s1012_s30, 4  ;;  %s1016_s8 = int_to_ptr.hbm [resolvable:$true] %s1015_s8 }
 0x1dc   : > { %v750_v3 = vpop.permute.xlu0 %749 }
 0x1dd   : > { %v915_v15 = vsel %vm911_vm3, %v1715_v34, %v750_v3 }
 0x1de   : > { %v924_v16 = vsel %vm920_vm4, %v915_v15, %v1814_v42 }
 0x1e1   : > { %901 = vrot.lane.b32.xlu1 %v1779_v28, %s1461_s16 }
 0x1e2   : > { %899 = vrot.lane.b32.xlu0 %v1731_v49, %s1461_s16  ;;  %s1379_s16 = sshra.s32 %s1016_s8, 4  ;;  %s1380_s16 = int_to_ptr.hbm [resolvable:$true] %s1379_s16 }
 0x1e3   : > { %v870_v7 = vpop.permute.xlu1 %869  ;;  %v866_v12 = vpop.permute.xlu2 %865  ;;  %s1381_s9 = scalar_lea.hbm %s1380_s16, 64  ;;  %p1386_p11 = scmp.lt.s32.totalorder %s1380_s16, %s1993_s7 }
 0x1e4   : > { %v756_v8 = vpop.permute.xlu0 %755  ;;  %p1382_p2 = scmp.ne.s32.totalorder %s1380_s16, %s1381_s9  ;;  %p1387_p12 = scmp.lt.s32.totalorder %s1385_s22, %s1381_s9 }
 0x1e5   : > { %v918_v9 = vsel %vm911_vm3, %v1731_v49, %v756_v8  ;;  %v933_v49 = vsel %vm929_vm5, %v924_v16, %v798_v58 }
 0x1e6   : > { %v927_v10 = vsel %vm920_vm4, %v918_v9, %v780_v48  ;;  %p1383_p4 = pnand %p1382_p2, %p1582_p9  ;;  %p1388_p13 = por %p1387_p12, %p1386_p11 }
 0x1e7   : > { %v936_v11 = vsel %vm929_vm5, %v927_v10, %v804_v2 }
 0x1e8   : > { %p1384_p8 = pneg %p1383_p4 }
 0x1ea   : > { %p1389_p0 = pnand %p1388_p13, %p1384_p8 }
 0x1eb   : > { %v876_v13 = vpop.permute.xlu1 %875  ;;  %v800_v17 = vpop.permute.xlu2 %799 }
 0x1ec   : > { %v822_v14 = vpop.permute.xlu0 %821 }
 0x1ed   : > { %v942_v21 = vsel %vm938_vm6, %v933_v49, %v822_v14 }
 0x1ee   : > { %v951_v34 = vsel %vm947_vm7, %v942_v21, %v846_v54 }
 0x1ef   : > { %v960_v27 = vsel %vm956_vm8, %v951_v34, %v870_v7 }
 0x1f3   : > { %v746_v18 = vpop.permute.xlu1 %745  ;;  %v1885_v30 = vpop.permute.xlu2 %805 }
 0x1f4   : > { %v828_v19 = vpop.permute.xlu0 %827  ;;  %v913_v37 = vsel %vm911_vm3, %v1755_v5, %v746_v18 }
 0x1f5   : > { %v945_v20 = vsel %vm938_vm6, %v936_v11, %v828_v19 }
 0x1f6   : > { %v954_v22 = vsel %vm947_vm7, %v945_v20, %v852_v63  ;;  %v978_v63 = vld [vmem:[%s1841_s13 + $0x20] sm:$0xff] }
 0x1f7   : > { %v1880_v24 = vsel %vm956_vm8, %v954_v22, %v876_v13 }
 0x1fb   : > { %v818_v25 = vpop.permute.xlu1 %817  ;;  %v872_v39 = vpop.permute.xlu2 %871 }
 0x1fc   : > { %v894_v29 = vpop.permute.xlu0 %893 }
 0x1fd   : > { %v969_v31 = vsel %vm965_vm9, %v960_v27, %v894_v29 }
 0x1fe   : > { %v985_v32 = vmul.f32 %v977_v26, %v969_v31 }
 0x200   : > { %993 = vst [vmem:[%s1854_s15 + $0x18] sm:$0xff] %v985_v32 }
 0x203   : > { %v890_v33 = vpop.permute.xlu1 %889  ;;  %v1898_v50 = vpop.permute.xlu2 %877 }
 0x204   : > { %v770_v36 = vpop.permute.xlu0 %769 }
 0x205   : > { %v922_v38 = vsel %vm920_vm4, %v913_v37, %v770_v36 }
 0x206   : > { %v931_v40 = vsel %vm929_vm5, %v922_v38, %v794_v4 }
 0x207   : > { %v940_v42 = vsel %vm938_vm6, %v931_v40, %v818_v25 }
 0x20b   : > { %v752_v41 = vpop.permute.xlu1 %751  ;;  %v748_v60 = vpop.permute.xlu2 %747 }
 0x20c   : > { %v842_v43 = vpop.permute.xlu0 %841  ;;  %v916_v55 = vsel %vm911_vm3, %v1770_v23, %v752_v41  ;;  %v914_v8 = vsel %vm911_vm3, %v1800_v35, %v748_v60 }
 0x20d   : > { %v949_v44 = vsel %vm947_vm7, %v940_v42, %v842_v43  ;;  %v981_v42 = vld [vmem:[%s1841_s13 + $0x38] sm:$0xff] }
 0x20e   : > { %v958_v46 = vsel %vm956_vm8, %v949_v44, %v866_v12  ;;  %v980_v44 = vld [vmem:[%s1841_s13 + $0x30] sm:$0xff] }
 0x20f   : > { %v967_v47 = vsel %vm965_vm9, %v958_v46, %v890_v33 }
 0x210   : > { %v983_v48 = vmul.f32 %v975_v45, %v967_v47 }
 0x212   : > { %991 = vst [vmem:[%s1854_s15 + $0x8] sm:$0xff] %v983_v48 }
 0x213   : > { %v758_v5 = vpop.permute.xlu1 %757  ;;  %v820_v58 = vpop.permute.xlu2 %819 }
 0x214   : > { %v776_v52 = vpop.permute.xlu0 %775  ;;  %v919_v26 = vsel %vm911_vm3, %v1779_v28, %v758_v5 }
 0x215   : > { %v925_v6 = vsel %vm920_vm4, %v916_v55, %v776_v52 }
 0x216   : > { %v934_v59 = vsel %vm929_vm5, %v925_v6, %v800_v17  ;;  %v976_v17 = vld [vmem:[%s1841_s13 + $0x10] sm:$0xff] }
 0x21b   : > { %v824_v53 = vpop.permute.xlu1 %823  ;;  %v892_v4 = vpop.permute.xlu2 %891 }
 0x21c   : > { %v782_v54 = vpop.permute.xlu0 %781  ;;  %v943_v61 = vsel %vm938_vm6, %v934_v59, %v824_v53 }
 0x21d   : > { %v928_v27 = vsel %vm920_vm4, %v919_v26, %v782_v54 }
 0x21e   : > { %v937_v28 = vsel %vm929_vm5, %v928_v27, %v1885_v30 }
 0x223   : > { %v830_v56 = vpop.permute.xlu1 %829  ;;  %v754_v12 = vpop.permute.xlu2 %753 }
 0x224   : > { %v848_v57 = vpop.permute.xlu0 %847  ;;  %v917_v21 = vsel %vm911_vm3, %v1824_v51, %v754_v12  ;;  %v979_v51 = vld [vmem:[%s1841_s13 + $0x28] sm:$0xff] }
 0x225   : > { %v952_v62 = vsel %vm947_vm7, %v943_v61, %v848_v57 }
 0x226   : > { %v961_v1 = vsel %vm956_vm8, %v952_v62, %v872_v39  ;;  %v946_v39 = vsel %vm938_vm6, %v937_v28, %v830_v56 }
 0x22b   : > { %v896_v0 = vpop.permute.xlu1 %895  ;;  %v826_v49 = vpop.permute.xlu2 %825 }
 0x22c   : > { %v970_v2 = vsel %vm965_vm9, %v961_v1, %v896_v0  ;;  %v854_v3 = vpop.permute.xlu0 %853 }
 0x22d   : > { %v986_v23 = vmul.f32 %v978_v63, %v970_v2  ;;  %v955_v41 = vsel %vm947_vm7, %v946_v39, %v854_v3 }
 0x22e   : > { %v964_v30 = vsel %vm956_vm8, %v955_v41, %v1898_v50 }
 0x22f   : > { %994 = vst [vmem:[%s1854_s15 + $0x20] sm:$0xff] %v986_v23 }
 0x233   : > { %v772_v7 = vpop.permute.xlu1 %771  ;;  %v898_v36 = vpop.permute.xlu2 %897 }
 0x234   : > { %v796_v9 = vpop.permute.xlu0 %795  ;;  %v923_v10 = vsel %vm920_vm4, %v914_v8, %v772_v7 }
 0x235   : > { %v932_v11 = vsel %vm929_vm5, %v923_v10, %v796_v9 }
 0x236   : > { %v941_v14 = vsel %vm938_vm6, %v932_v11, %v820_v58 }
 0x23b   : > { %v844_v13 = vpop.permute.xlu1 %843 }
 0x23c   : > { %v950_v15 = vsel %vm947_vm7, %v941_v14, %v844_v13  ;;  %v868_v16 = vpop.permute.xlu0 %867 }
 0x23d   : > { %v959_v18 = vsel %vm956_vm8, %v950_v15, %v868_v16 }
 0x23e   : > { %v968_v19 = vsel %vm965_vm9, %v959_v18, %v892_v4 }
 0x23f   : > { %v984_v35 = vmul.f32 %v976_v17, %v968_v19 }
 0x241   : > { %992 = vst [vmem:[%s1854_s15 + $0x10] sm:$0xff] %v984_v35 }
 0x243   : > { %v778_v20 = vpop.permute.xlu1 %777 }
 0x244   : > { %v802_v22 = vpop.permute.xlu0 %801  ;;  %v926_v34 = vsel %vm920_vm4, %v917_v21, %v778_v20 }
 0x245   : > { %v935_v25 = vsel %vm929_vm5, %v926_v34, %v802_v22 }
 0x246   : > { %v944_v31 = vsel %vm938_vm6, %v935_v25, %v826_v49 }
 0x24b   : > { %v850_v29 = vpop.permute.xlu1 %849 }
 0x24c   : > { %v953_v32 = vsel %vm947_vm7, %v944_v31, %v850_v29  ;;  %v874_v33 = vpop.permute.xlu0 %873 }
 0x24d   : > { %v962_v37 = vsel %vm956_vm8, %v953_v32, %v874_v33 }
 0x24e   : > { %v971_v38 = vsel %vm965_vm9, %v962_v37, %v898_v36 }
 0x24f   : > { %v987_v40 = vmul.f32 %v979_v51, %v971_v38 }
 0x251   : > { %995 = vst [vmem:[%s1854_s15 + $0x28] sm:$0xff] %v987_v40 }
 0x253   : > { %v902_v43 = vpop.permute.xlu1 %901 }
 0x254   : > { %v973_v45 = vsel %vm965_vm9, %v964_v30, %v902_v43  ;;  %v900_v46 = vpop.permute.xlu0 %899 }
 0x255   : > { %v989_v47 = vmul.f32 %v981_v42, %v973_v45  ;;  %v972_v48 = vsel %vm965_vm9, %v1880_v24, %v900_v46 }
 0x256   : > { %v988_v5 = vmul.f32 %v980_v44, %v972_v48 }
 0x257   : > { %997 = vst [vmem:[%s1854_s15 + $0x38] sm:$0xff] %v989_v47 }
 0x258   : > { %996 = vst [vmem:[%s1854_s15 + $0x30] sm:$0xff] %v988_v5 }
 0x259   : > { %1392 = shalt.err (!%p1389_p0)
}
 0x25a   : > { %s1462_s18 = smov 128   ;;  %s1463_s15 = smov 8  }
 0x25b   : > { %1208 = dma.vmem_to_hbm [thread:$0]  (%p1582_p9), %s1014_s27, 1024, %s1016_s8, %s999_s0, %s1462_s18, %s1462_s18, %s1463_s15  }
 0x25c PF: > { %s1030_s19 = sand.u32 1, %s1431_s24   ;;  %p2004_p3 = scmp.ge.s32.totalorder %s1451_s29, 2 }
 0x25d   : > { %s1031_s10 = scalar_lea.sflag [#allocation4], %s1030_s19 }
 0x25e   : > { %p1219_p5 = pnand %p2004_p3, %p1553_p6 }
 0x260   : > { %p1220_p7 = pneg %p1219_p5 }
 0x262   : > { %1426 = dma.done.wait (%p1220_p7), %s1031_s10, 1024  }
 0x263   : > { %1428 = vsyncadd (%p1220_p7), %s1031_s10, 4294966272  ;;  %s24_s29 = sadd.s32 1, %s1451_s29   ;;  %s2005_s21 = sld [smem:[#allocation11_spill]] }
 0x264   : > { %p21_p10 = scmp.ge.s32.totalorder %s24_s29, 4   ;;  %s2006_s24 = smov %s1435_s25 }
 0x265   : > { %s2007_s25 = smov %s1439_s26  ;;  %s2008_s26 = smov %s1588_s23 }
 0x266   : > { %s2009_s27 = smov %s1447_s28  ;;  %23 = sbr.rel (!%p21_p10) target bundleno = 9 (0x9), region = 107 }
 0x269   : > { %s2010_s28 = smov %s2005_s21 }
 0x26b   :  { %1037 = vsyncpa [#allocation3], 1 }
 0x26c   :  { %1039 = vsyncpa [#allocation3 + $0x1], 1 }
 0x26d   :  { %1040 = vsyncpa [#allocation4], 1 }
 0x26e   :  { %1042 = vsyncpa [#allocation4 + $0x1], 1 }
 0x26f   :  { %1043 = vsyncpa [#allocation5], 1 }
 0x270   :  { %1045 = vsyncpa [#allocation5 + $0x1], 1 }

</bundles_post_ra>
